<compile_context>
chip_gen: v7x
topology: tpu7x:2x2x1
jax: 0.10.0
libtpu: 0.0.40
codegen_flags: <defaults>
</compile_context>

<pallas_src>
import math

import jax
import jax.numpy as jnp
from jax.experimental import pallas as pl
from jax.experimental.pallas import tpu as pltpu

EPS = 1e-5
NEG_INF = -1e30
LANE = 128


# --------------------------------------------------------------------------
# small helpers
# --------------------------------------------------------------------------
def _round_up(x, m):
    return ((x + m - 1) // m) * m


def _nbytes(shape, dtype=jnp.float32):
    n = 1
    for s in shape:
        n *= int(s)
    return n * jnp.dtype(dtype).itemsize


def _vmem_capacity():
    try:
        return int(pltpu.get_tpu_info().vmem_capacity_bytes)
    except Exception:
        return 64 << 20  # conservative (v7x-sized) default


def _clamp_vmem(est_bytes, cap):
    hi = max(32 << 20, cap - (16 << 20))          # keep headroom for the compiler
    return int(min(max(int(est_bytes) + (4 << 20), 32 << 20), hi))


def _pick_tile(ngp, per_col_bytes, budget_bytes):
    """Largest multiple-of-128 divisor of ngp whose streamed footprint fits."""
    target = max(LANE, budget_bytes // max(int(per_col_bytes), 1))
    target = max(LANE, min(ngp, (target // LANE) * LANE))
    t = target
    while ngp % t:
        t -= LANE
    return t


def _auto_n_splits():
    # v7x has 2 TensorCores per chip; v5e/v6e have 1.
    try:
        kind = jax.devices()[0].device_kind.lower()
    except Exception:
        return 1
    return 2 if "v7" in kind else 1


def _full_spec(shape):
    nd = len(shape)

    def idx(i):
        return (0,) * nd

    return pl.BlockSpec(shape, idx)


def _layernorm(h, gamma, beta):
    # Exact two-pass variance (matches nn.LayerNorm; avoids cancellation).
    mu = jnp.mean(h, axis=-1, keepdims=True)
    c = h - mu
    var = jnp.mean(c * c, axis=-1, keepdims=True)
    return c * jax.lax.rsqrt(var + EPS) * gamma + beta


# --------------------------------------------------------------------------
# Kernel 1: streamed gene reduction  q1_partial[s] = sum_g x_tile @ Wq1_tile
# grid = (n_splits "parallel", gene_tiles_per_split "arbitrary")
# --------------------------------------------------------------------------
def _q1_partial_kernel(x_ref, wq1_ref, part_ref):
    @pl.when(pl.program_id(1) == 0)
    def _():
        part_ref[...] = jnp.zeros_like(part_ref)

    part_ref[...] += jnp.dot(
        x_ref[...], wq1_ref[...], preferred_element_type=jnp.float32)[None]


# --------------------------------------------------------------------------
# Kernel 2: epilogue (tiny, grid=(1,)) — Q head, attention, wlat, dec hidden
# --------------------------------------------------------------------------
def _epilogue_kernel(part_ref, bq1_ref, g1_ref, be1_ref, wq2_ref, bq2_ref,
                     kT_ref, mask_ref, ce_ref, wd1_ref, bd1_ref, g2_ref,
                     be2_ref, w_ref, wlat_ref, d_ref):
    # Combine the per-TensorCore partial gene sums.
    q1 = jnp.sum(part_ref[...], axis=0)

    # Q head: bias + LayerNorm + ReLU + Linear.
    h = jnp.maximum(_layernorm(q1 + bq1_ref[...], g1_ref[...], be1_ref[...]), 0.0)
    q = jnp.dot(h, wq2_ref[...], preferred_element_type=jnp.float32) + bq2_ref[...]

    # Attention over the padded, lane-dense cell-line axis.
    scale = 1.0 / math.sqrt(q.shape[-1])
    attn = jnp.dot(q, kT_ref[...], preferred_element_type=jnp.float32) * scale
    attn = attn + mask_ref[...]                      # -inf on padded columns
    m = jnp.max(attn, axis=-1, keepdims=True)
    e = jnp.exp(attn - m)
    w = e / jnp.sum(e, axis=-1, keepdims=True)       # exact divide
    w_ref[...] = w.astype(w_ref.dtype)

    # Weighted latent embedding + decoder hidden activation.
    wlat = jnp.dot(w, ce_ref[...], preferred_element_type=jnp.float32)
    wlat_ref[...] = wlat.astype(wlat_ref.dtype)
    d = _layernorm(
        jnp.dot(wlat, wd1_ref[...], preferred_element_type=jnp.float32)
        + bd1_ref[...], g2_ref[...], be2_ref[...])
    d_ref[...] = jnp.maximum(d, 0.0).astype(d_ref.dtype)


# --------------------------------------------------------------------------
# Kernel 3: the two [B, n_genes] outputs, streamed over gene tiles ("parallel")
# --------------------------------------------------------------------------
def _gene_out_kernel(w_ref, d_ref, cx_ref, wd2_ref, bd2_ref,
                     wexp_ref, recon_ref):
    wexp_ref[...] = jnp.dot(
        w_ref[...], cx_ref[...],
        preferred_element_type=jnp.float32).astype(wexp_ref.dtype)
    recon_ref[...] = (
        jnp.dot(d_ref[...], wd2_ref[...], preferred_element_type=jnp.float32)
        + bd2_ref[...]).astype(recon_ref.dtype)


# --------------------------------------------------------------------------
# One-time, batch-independent preparation (cache the result across calls)
# --------------------------------------------------------------------------
def tcga_weightencoder_prepare(params, celine_embs, celine_exps,
                               stream_dtype=jnp.bfloat16):
    n_genes, n_latent = params["wq1"].shape
    n_celines = celine_embs.shape[0]
    ngp = _round_up(n_genes, LANE)
    ncp = _round_up(n_celines, LANE)
    gpad = ngp - n_genes
    cpad = ncp - n_celines

    ce32 = celine_embs.astype(jnp.float32)
    # K branch hoisted (batch-independent) and pre-transposed: no in-kernel .T
    kT = jnp.pad((ce32 @ params["wk"]).T, ((0, 0), (0, cpad)))
    mask = jnp.concatenate(
        [jnp.zeros((1, n_celines), jnp.float32),
         jnp.full((1, cpad), NEG_INF, jnp.float32)], axis=1)

    return {
        "n_genes": int(n_genes),
        "n_celines": int(n_celines),
        "stream_dtype": stream_dtype,
        # big streamed operands: gene axis padded to x128, bf16 stream dtype
        "wq1": jnp.pad(params["wq1"], ((0, gpad), (0, 0))).astype(stream_dtype),
        "wd2": jnp.pad(params["wd2"], ((0, 0), (0, gpad))).astype(stream_dtype),
        "cx": jnp.pad(celine_exps.astype(jnp.float32),
                      ((0, cpad), (0, gpad))).astype(stream_dtype),
        "bd2": jnp.pad(params["bd2"], ((0, 0), (0, gpad))),
        # small, kept in f32
        "bq1": params["bq1"], "g1": params["g1"], "be1": params["be1"],
        "wq2": params["wq2"], "bq2": params["bq2"],
        "kT": kT, "mask": mask, "ce": jnp.pad(ce32, ((0, cpad), (0, 0))),
        "wd1": params["wd1"], "bd1": params["bd1"],
        "g2": params["g2"], "be2": params["be2"],
    }


# --------------------------------------------------------------------------
# Forward
# --------------------------------------------------------------------------
def tcga_weightencoder_forward(x, prep, *, tg_a=None, tg_b=None, n_splits=None):
    sd = prep["stream_dtype"]
    isz = jnp.dtype(sd).itemsize
    n_genes = prep["n_genes"]
    n_celines = prep["n_celines"]
    ngp, n_latent = prep["wq1"].shape
    nc_pad = prep["ce"].shape[0]
    hidden = prep["wd1"].shape[1]
    B = x.shape[0]

    cap = _vmem_capacity()
    usable = max(32 << 20, cap - (16 << 20))
    stream_budget = usable // 2

    # per-call input: pad the gene axis (cheap, B x pad) and cast to bf16
    xp = x if ngp == n_genes else jnp.pad(x, ((0, 0), (0, ngp - n_genes)))
    xp = xp.astype(sd)

    # ---------------- Kernel 1: streamed gene reduction --------------------
    if tg_a is None:
        tg_a = _pick_tile(ngp, 2 * (B + n_latent) * isz, stream_budget)
    n_gt_a = ngp // tg_a
    if n_splits is None:
        n_splits = _auto_n_splits()
    n_splits = max(1, math.gcd(int(n_splits), n_gt_a))
    gpt = n_gt_a // n_splits

    a_vmem = _clamp_vmem(2 * (B + n_latent) * tg_a * isz
                         + 2 * B * n_latent * 4, cap)

    def _x_map(s, g):
        return (0, s * gpt + g)

    def _wq1_map(s, g):
        return (s * gpt + g, 0)

    def _part_map(s, g):
        return (s, 0, 0)

    partials = pl.pallas_call(
        _q1_partial_kernel,
        out_shape=jax.ShapeDtypeStruct((n_splits, B, n_latent), jnp.float32),
        grid=(n_splits, gpt),
        in_specs=[pl.BlockSpec((B, tg_a), _x_map),
                  pl.BlockSpec((tg_a, n_latent), _wq1_map)],
        out_specs=pl.BlockSpec((1, B, n_latent), _part_map),
        compiler_params=pltpu.CompilerParams(
            dimension_semantics=("parallel", "arbitrary"),
            vmem_limit_bytes=a_vmem),
    )(xp, prep["wq1"])

    # ---------------- Kernel 2: epilogue (tiny) -----------------------------
    small_in = [partials, prep["bq1"], prep["g1"], prep["be1"], prep["wq2"],
                prep["bq2"], prep["kT"], prep["mask"], prep["ce"],
                prep["wd1"], prep["bd1"], prep["g2"], prep["be2"]]
    e_out_shapes = (jax.ShapeDtypeStruct((B, nc_pad), jnp.float32),
                    jax.ShapeDtypeStruct((B, n_latent), jnp.float32),
                    jax.ShapeDtypeStruct((B, hidden), jnp.float32))
    e_vmem = _clamp_vmem(2 * (sum(_nbytes(a.shape) for a in small_in)
                              + sum(_nbytes(s.shape) for s in e_out_shapes)), cap)

    w_pad, wlat, d_hidden = pl.pallas_call(
        _epilogue_kernel,
        out_shape=e_out_shapes,
        grid=(1,),
        in_specs=[_full_spec(a.shape) for a in small_in],
        out_specs=tuple(_full_spec(s.shape) for s in e_out_shapes),
        compiler_params=pltpu.CompilerParams(
            dimension_semantics=("arbitrary",),
            vmem_limit_bytes=e_vmem),
    )(*small_in)

    # ---------------- Kernel 3: gene-tiled outputs --------------------------
    if tg_b is None:
        percol = 2 * (nc_pad + hidden) * isz + 2 * 4 + 4 * B * 4
        tg_b = _pick_tile(ngp, percol, stream_budget)
    n_gt_b = ngp // tg_b

    def _k3_bytes(nbuf):
        return (nbuf * (nc_pad + hidden) * tg_b * isz    # streamed cx / Wd2 tiles
                + 2 * tg_b * 4                           # bd2 tile
                + 2 * (B * nc_pad + B * hidden) * 4      # resident inputs (dbl buf)
                + 2 * 2 * B * tg_b * 4)                  # two output tiles

    use_tri = n_gt_b > 2 and (_k3_bytes(3) + (4 << 20)) <= usable

    def _gene_map(g):
        return (0, g)

    def _stream_spec(rows):
        if use_tri:
            try:
                return pl.BlockSpec((rows, tg_b), _gene_map,
                                    pipeline_mode=pl.Buffered(3))
            except TypeError:
                pass
        return pl.BlockSpec((rows, tg_b), _gene_map)

    b_vmem = _clamp_vmem(_k3_bytes(3 if use_tri else 2), cap)
    b_out_shapes = (jax.ShapeDtypeStruct((B, ngp), jnp.float32),
                    jax.ShapeDtypeStruct((B, ngp), jnp.float32))

    wexp_pad, recon_pad = pl.pallas_call(
        _gene_out_kernel,
        out_shape=b_out_shapes,
        grid=(n_gt_b,),
        in_specs=[_full_spec((B, nc_pad)),        # weights (pad cols exactly 0)
                  _full_spec((B, hidden)),        # decoder hidden
                  _stream_spec(nc_pad),           # celine_exps tile (bf16)
                  _stream_spec(hidden),           # Wd2 tile         (bf16)
                  pl.BlockSpec((1, tg_b), _gene_map)],
        out_specs=(pl.BlockSpec((B, tg_b), _gene_map),
                   pl.BlockSpec((B, tg_b), _gene_map)),
        compiler_params=pltpu.CompilerParams(
            dimension_semantics=("parallel",),
            vmem_limit_bytes=b_vmem),
    )(w_pad, d_hidden, prep["cx"], prep["wd2"], prep["bd2"])

    weights = w_pad[:, :n_celines]
    wexp = wexp_pad[:, :n_genes]
    recon = recon_pad[:, :n_genes]
    return weights, wlat, wexp, recon


# --------------------------------------------------------------------------
# Parameters & pure-JAX reference
# --------------------------------------------------------------------------
def init_params(key, n_genes, n_latent, hidden=256):
    ks = jax.random.split(key, 5)

    def lin(k, fan_in, fan_out):
        bound = 1.0 / math.sqrt(fan_in)
        kw, kb = jax.random.split(k)
        w = jax.random.uniform(kw, (fan_in, fan_out), jnp.float32, -bound, bound)
        b = jax.random.uniform(kb, (1, fan_out), jnp.float32, -bound, bound)
        return w, b

    wq1, bq1 = lin(ks[0], n_genes, n_latent)
    wq2, bq2 = lin(ks[1], n_latent, n_latent)
    wk, _ = lin(ks[2], n_latent, n_latent)            # K has no bias
    wd1, bd1 = lin(ks[3], n_latent, hidden)
    wd2, bd2 = lin(ks[4], hidden, n_genes)
    return {
        "wq1": wq1, "bq1": bq1,
        "g1": jnp.ones((1, n_latent), jnp.float32),
        "be1": jnp.zeros((1, n_latent), jnp.float32),
        "wq2": wq2, "bq2": bq2, "wk": wk,
        "wd1": wd1, "bd1": bd1,
        "g2": jnp.ones((1, hidden), jnp.float32),
        "be2": jnp.zeros((1, hidden), jnp.float32),
        "wd2": wd2, "bd2": bd2,
    }


def reference_forward(x, ce, cx, p, stream_dtype=None):
    # stream_dtype != None reproduces the kernel's bf16 streaming numerics
    # (bf16-rounded operands, f32 accumulation) for an apples-to-apples check.
    def cast(a):
        return a if stream_dtype is None else a.astype(stream_dtype).astype(jnp.float32)

    def ln(h, g, b):
        mu = jnp.mean(h, -1, keepdims=True)
        var = jnp.mean((h - mu) ** 2, -1, keepdims=True)
        return (h - mu) / jnp.sqrt(var + EPS) * g + b

    h = jnp.maximum(ln(cast(x) @ cast(p["wq1"]) + p["bq1"], p["g1"], p["be1"]), 0.0)
    q = h @ p["wq2"] + p["bq2"]
    k = ce @ p["wk"]
    attn = (q @ k.T) / jnp.sqrt(jnp.float32(q.shape[1]))
    w = jax.nn.softmax(attn, axis=1)
    wlat = w @ ce
    wexp = w @ cast(cx)
    d = jnp.maximum(ln(wlat @ p["wd1"] + p["bd1"], p["g2"], p["be2"]), 0.0)
    recon = d @ cast(p["wd2"]) + p["bd2"]
    return w, wlat, wexp, recon


if __name__ == "__main__":
    # Small demo shapes; non-128 gene count and non-128 cell-line count
    # exercise the padding paths.
    B, n_genes, n_latent, n_celines, hidden = 8, 1000, 128, 97, 256

    key = jax.random.PRNGKey(0)
    kx, ke, kc, kp = jax.random.split(key, 4)
    x = jax.random.normal(kx, (B, n_genes), jnp.float32)
    celine_embs = jax.random.normal(ke, (n_celines, n_latent), jnp.float32)
    celine_exps = jax.random.normal(kc, (n_celines, n_genes), jnp.float32)
    params = init_params(kp, n_genes, n_latent, hidden)

    prep = tcga_weightencoder_prepare(params, celine_embs, celine_exps,
                                      stream_dtype=jnp.bfloat16)

    # Small forced tiles + a 2-way reduction split so the streamed reduction,
    # partial-accumulator combine, and parallel output tiling are actually
    # exercised at this demo size (auto-tuning would pick single full tiles).
    outs = tcga_weightencoder_forward(x, prep, tg_a=256, tg_b=256, n_splits=2)
    outs = jax.block_until_ready(outs)

    refs = reference_forward(x, celine_embs, celine_exps, params,
                             stream_dtype=jnp.bfloat16)
    names = ("weights", "wlatent_emb", "wexp_emb", "recon")
    for name, o, r in zip(names, outs, refs):
        assert o.shape == r.shape, name
        err = float(jnp.max(jnp.abs(o - r)))
        assert err < 2e-3, f"{name} mismatch vs JAX reference: {err}"

    print("KERNEL_OK")
</pallas_src>

<mosaic_0001>
module attributes {stable_mosaic.version = 11 : i64} {
  func.func @_q1_partial_kernel(%arg0: i32, %arg1: i32, %arg2: memref<8x256xbf16, #tpu.memory_space<vmem>>, %arg3: memref<256x128xbf16, #tpu.memory_space<vmem>>, %arg4: memref<1x8x128xf32, #tpu.memory_space<vmem>>) attributes {dimension_semantics = [#tpu.dimension_semantics<parallel>, #tpu.dimension_semantics<arbitrary>], iteration_bounds = array<i64: 2, 2>, scalar_prefetch = 0 : i64, scratch_operands = 0 : i64, tpu.core_type = #tpu.core_type<tc>, window_params = [{transform_indices = @transform_0, window_bounds = array<i64: 8, 256>}, {transform_indices = @transform_1, window_bounds = array<i64: 256, 128>}, {transform_indices = @transform_2, window_bounds = array<i64: 1, 8, 128>}]} {
    %c0_i32 = arith.constant 0 : i32
    %0 = arith.cmpi eq, %arg1, %c0_i32 : i32
    %1 = arith.extui %0 : i1 to i32
    %c0_i32_0 = arith.constant 0 : i32
    %2 = arith.cmpi ne, %1, %c0_i32_0 : i32
    scf.if %2 {
      %cst_10 = arith.constant 0.000000e+00 : f32
      %10 = vector.broadcast %cst_10 : f32 to vector<1x8x128xf32>
      %c0_11 = arith.constant 0 : index
      %c0_12 = arith.constant 0 : index
      %c0_13 = arith.constant 0 : index
      %11 = vector.load %arg4[%c0_11, %c0_12, %c0_13] : memref<1x8x128xf32, #tpu.memory_space<vmem>>, vector<1x8x128xf32>
      tpu.vector_store %arg4[%c0_11, %c0_12, %c0_13], %10 {strides = array<i32>} : memref<1x8x128xf32, #tpu.memory_space<vmem>>, vector<1x8x128xf32>,
    } else {
    }
    %c0 = arith.constant 0 : index
    %c0_1 = arith.constant 0 : index
    %c0_2 = arith.constant 0 : index
    %3 = vector.load %arg4[%c0, %c0_1, %c0_2] : memref<1x8x128xf32, #tpu.memory_space<vmem>>, vector<1x8x128xf32>
    %c0_3 = arith.constant 0 : index
    %c0_4 = arith.constant 0 : index
    %4 = vector.load %arg2[%c0_3, %c0_4] : memref<8x256xbf16, #tpu.memory_space<vmem>>, vector<8x256xbf16>
    %c0_5 = arith.constant 0 : index
    %c0_6 = arith.constant 0 : index
    %5 = vector.load %arg3[%c0_5, %c0_6] : memref<256x128xbf16, #tpu.memory_space<vmem>>, vector<256x128xbf16>
    %cst = arith.constant dense<0.000000e+00> : vector<8x128xf32>
    %6 = tpu.matmul %4, %5, %cst {dimension_numbers = #tpu.dot_dimension_numbers<[1], [0], [0], [1], [0, 0, 1, 1], [], []>} : vector<8x256xbf16>, vector<256x128xbf16>, vector<8x128xf32> -> vector<8x128xf32>
    %7 = vector.shape_cast %6 : vector<8x128xf32> to vector<1x8x128xf32>
    %8 = arith.addf %3, %7 : vector<1x8x128xf32>
    %c0_7 = arith.constant 0 : index
    %c0_8 = arith.constant 0 : index
    %c0_9 = arith.constant 0 : index
    %9 = vector.load %arg4[%c0_7, %c0_8, %c0_9] : memref<1x8x128xf32, #tpu.memory_space<vmem>>, vector<1x8x128xf32>
    tpu.vector_store %arg4[%c0_7, %c0_8, %c0_9], %8 {strides = array<i32>} : memref<1x8x128xf32, #tpu.memory_space<vmem>>, vector<1x8x128xf32>,
    return
  }
  func.func @transform_0(%arg0: i32, %arg1: i32) -> (i32, i32) {
    %c2_i32 = arith.constant 2 : i32
    %0 = arith.muli %arg0, %c2_i32 : i32
    %1 = arith.addi %0, %arg1 : i32
    %c0_i32 = arith.constant 0 : i32
    %c0_i32_0 = arith.constant 0 : i32
    return %c0_i32, %1 : i32, i32
  }
  func.func @transform_1(%arg0: i32, %arg1: i32) -> (i32, i32) {
    %c2_i32 = arith.constant 2 : i32
    %0 = arith.muli %arg0, %c2_i32 : i32
    %1 = arith.addi %0, %arg1 : i32
    %c0_i32 = arith.constant 0 : i32
    %c0_i32_0 = arith.constant 0 : i32
    return %1, %c0_i32 : i32, i32
  }
  func.func @transform_2(%arg0: i32, %arg1: i32) -> (i32, i32, i32) {
    %c0_i32 = arith.constant 0 : i32
    %c0_i32_0 = arith.constant 0 : i32
    %c0_i32_1 = arith.constant 0 : i32
    return %arg0, %c0_i32, %c0_i32_0 : i32, i32, i32
  }
}

</mosaic_0001>

<bundles_post_ra>
// kernel: tpu_custom_call.1
= control target key start
LH: loop header
LB: loop body
LE: loop exit
PB: predicated region body
PF: predicated region fallthrough
CT: control target
= control target key end

     0   :  { %s1246_s0 = inlined_call_operand.hbm [shape: bf16[8,1024], index: 0, kind: input, shape index: {}]   ;;  %s1247_s1 = inlined_call_operand.hbm [shape: bf16[1024,128], index: 1, kind: input, shape index: {}]   ;;  %s1248_s2 = inlined_call_operand.hbm [shape: f32[2,8,128], index: 2, kind: output, shape index: {}]  }
   0x1   :  { %1253 = sst [smem:[#allocation13_spill]] %s1246_s0 }
   0x2   :  { %7 = vsyncpa [#allocation3], 0 }
   0x3   :  { %9 = vsyncpa [#allocation3 + $0x1], 0 }
   0x4   :  { %10 = vsyncpa [#allocation6], 0 }
   0x5   :  { %12 = vsyncpa [#allocation6 + $0x1], 0 }
   0x6   :  { %13 = vsyncpa [#allocation4], 0 }
   0x7   :  { %15 = vsyncpa [#allocation4 + $0x1], 0  ;;  %s941_s9 = smov 0   ;;  %s943_s10 = smov 0  }
   0x8   :  { %s945_s11 = smov 0   ;;  %s947_s12 = smov 0  }
   0x9   :  { %s949_s13 = smov 0   ;;  %s951_s14 = smov 0  }
   0xa   :  { %s953_s15 = smov 0   ;;  %s955_s16 = smov 0  }
   0xb   :  { %s957_s17 = smov 0   ;;  %s959_s18 = smov 0  }
   0xc   :  { %s961_s19 = smov 0  }
   0xd LB: > { %s537_s20 = sadd.s32 4294967295, %s918_s19   ;;  %s538_s21 = sadd.s32 4294967294, %s918_s19   ;;  %s918_s19 = sphi %s961_s19, %s21_s19   ;;  %s914_s18 = sphi %s959_s18, %s1279_s18   ;;  %s910_s17 = sphi %s957_s17, %s1278_s17   ;;  %s906_s16 = sphi %s955_s16, %s1277_s16   ;;  %s902_s15 = sphi %s953_s15, %s1276_s15   ;;  %s898_s14 = sphi %s951_s14, %s1275_s14   ;;  %s894_s13 = sphi %s949_s13, %s1274_s13   ;;  %s890_s12 = sphi %s947_s12, %s1273_s12   ;;  %s886_s11 = sphi %s945_s11, %s1272_s11   ;;  %s882_s10 = sphi %s943_s10, %s1271_s10   ;;  %s878_s9 = sphi %s941_s9, %s1270_s9  }
   0xe   : > { %s30_s22 = sadd.s32 1, %s910_s17  ;;  %s33_s23 = sadd.s32 1, %s914_s18 }
   0xf   : > { %p31_p0 = scmp.ge.s32.totalorder %s30_s22, 2  ;;  %s539_s24 = sshll.u32 %s914_s18, 1 }
  0x10   : > { %s1000_s25 = sadd.s32 %s910_s17, %s539_s24  ;;  %s44_s26 = sadd.s32 1, %s898_s14 }
  0x11   : > { %s1281_s22 = smov (%p31_p0, %s30_s22), 0  ;;  %s1283_s23 = smov (!%p31_p0, %s33_s23), %s914_s18 }
  0x12   : > { %1254 = sst [smem:[#allocation11_spill]] %s1281_s22  ;;  %p51_p1 = scmp.ne.s32.totalorder %s898_s14, %s894_s13 }
  0x13   : > { %p52_p2 = scmp.eq.s32.totalorder %s918_s19, 0  ;;  %p35_p3 = scmp.ge.s32.totalorder %s1283_s23, 2 }
  0x14   : > { %p57_p4 = scmp.ne.s32.totalorder %s894_s13, %s890_s12  ;;  %p58_p6 = scmp.eq.s32.totalorder %s537_s20, 0 }
  0x15   : > { %p1010_p5 = por %p52_p2, %p51_p1  ;;  %s1285_s23 = smov (%p35_p3, %s1283_s23), 0 }
  0x16   : > { %1256 = sst [smem:[#allocation12_spill]] %s1285_s23  ;;  %p1016_p7 = por %p58_p6, %p57_p4 }
  0x17   : > { %s100_s29 = sadd.s32 1, %s886_s11  ;;  %s540_s30 = sshll.u32 %s1285_s23, 1 }
  0x18   : > { %s1257_s28 = scalar_select %p1016_p7, 1, 0 }
  0x19   : > { %s97_s3 = ssub.s32 %s914_s18, %s1285_s23  ;;  %s40_s4 = sadd.s32 %s540_s30, %s1281_s22 }
  0x1a   : > { %p98_p8 = scmp.eq.s32.totalorder %s97_s3, 0  ;;  %s41_s5 = ssub.s32 %s1000_s25, %s40_s4 }
  0x1b   : > { %p110_p9 = scmp.ne.s32.totalorder %s886_s11, %s882_s10  ;;  %p42_p10 = scmp.eq.s32.totalorder %s41_s5, 0 }
  0x1c   : > { %p111_p11 = scmp.eq.s32.totalorder %s537_s20, 3  ;;  %p116_p13 = scmp.ne.s32.totalorder %s882_s10, %s878_s9 }
  0x1d   : > { %s1029_s6 = scalar_select %p98_p8, %s886_s11, %s100_s29  }
  0x1e   : > { %s1032_s7 = scalar_select %p42_p10, %s898_s14, %s44_s26  }
  0x1f   : > { %p1034_p12 = por %p111_p11, %p110_p9  ;;  %p117_p0 = scmp.eq.s32.totalorder %s538_s21, 3 }
  0x20   : > { %p621_p1 = scmp.lt.s32.totalorder %s918_s19, 4  ;;  %s1044_s12 = sand.u32 1, %s898_s14  }
  0x21   : > { %s1258_s8 = scalar_select %p1034_p12, 1, 0 }
  0x22   : > { %p1046_p2 = por %p117_p0, %p116_p13  ;;  %s545_s24 = sshll.u32 %s1044_s12, 3 }
  0x23   : > { %s580_s29 = sshll.u32 %s1000_s25, 7  ;;  %s1260_s0 = sld [smem:[#allocation13_spill]] }
  0x24   : > { %s1259_s20 = scalar_select %p1046_p2, 1, 0 }
  0x25   : > { %s141_s21 = scalar_lea.vmem [#allocation2], %s545_s24  ;;  %p1059_p3 = pnand %p621_p1, %p1010_p5 }
  0x26   : > { %s151_s4 = sshll.u32 %s141_s21, 4  ;;  %s138_s26 = scalar_lea.sflag [#allocation3], %s1044_s12  ;;  %s1063_s4 = int_to_ptr.vmem [resolvable:$true] %s151_s4 }
  0x27   : > { %p734_p8 = pneg %p1059_p3 }
  0x29   : > { %s1055_s3 = scalar_lea.hbm %s1260_s0, %s580_s29  ;;  %s737_s30 = scalar_lea.hbm %s1260_s0, 512 }
  0x2a   : > { %s732_s29 = scalar_lea.hbm %s1055_s3, 128  ;;  %p738_p5 = scmp.lt.u32.totalorder %s1055_s3, %s1260_s0 }
  0x2b   : > { %p733_p6 = scmp.ne.s32.totalorder %s1055_s3, %s732_s29  ;;  %p739_p11 = scmp.lt.u32.totalorder %s737_s30, %s732_s29 }
  0x2c   : > { %p741_p0 = scmp.lt.u32.totalorder %s732_s29, %s1055_s3 }
  0x2d   : > { %p735_p9 = pnand %p734_p8, %p733_p6  ;;  %p740_p13 = por %p739_p11, %p738_p5 }
  0x2f   : > { %p736_p10 = pneg %p735_p9  ;;  %p742_p1 = por %p741_p0, %p740_p13 }
  0x31   : > { %p743_p4 = pnand %p742_p1, %p736_p10 }
  0x33   : > { %746 = shalt.err (!%p743_p4)
}
  0x34   : > { %s747_s23 = scalar_lea.vmem %s1063_s4, 128  ;;  %s920_s27 = smov [#allocation2]  }
  0x35   : > { %p748_p6 = scmp.ne.s32.totalorder %s1063_s4, %s747_s23  ;;  %s752_s24 = sshll.u32 %s920_s27, 4  ;;  %s753_s24 = int_to_ptr.vmem [resolvable:$false] %s752_s24 }
  0x36   : > { %s754_s22 = scalar_lea.vmem %s753_s24, 256  ;;  %p755_p12 = scmp.lt.s32.totalorder %s1063_s4, %s753_s24 }
  0x37   : > { %p750_p9 = pnand %p748_p6, %p734_p8  ;;  %p756_p5 = scmp.lt.s32.totalorder %s754_s22, %s747_s23 }
  0x39   : > { %p751_p2 = pneg %p750_p9  ;;  %p757_p11 = por %p756_p5, %p755_p12 }
  0x3b   : > { %p758_p13 = pnand %p757_p11, %p751_p2 }
  0x3d   : > { %761 = shalt.err (!%p758_p13)
}
  0x3e   : > { %613 = dma.hbm_to_vmem [thread:$0]  (!%p1059_p3), %s1055_s3, 128, %s1063_s4, %s138_s26  }
  0x3f   : > { %p179_p4 = scmp.lt.s32.totalorder %s918_s19, 5  ;;  %s549_s29 = sshll.u32 %s1044_s12, 7 }
  0x40   : > { %s1262_s30 = sshll.u32 %s1000_s25, 11  ;;  %p1263_p12 = scmp.ge.s32.totalorder %s918_s19, 1 }
  0x41   : > { %s1100_s23 = scalar_lea.hbm %s1247_s1, %s1262_s30  ;;  %s162_s22 = scalar_lea.vmem [#allocation5], %s549_s29 }
  0x42   : > { %p1104_p2 = pnand %p1263_p12, %p179_p4  ;;  %s171_s0 = sshll.u32 %s162_s22, 4  ;;  %s1108_s0 = int_to_ptr.vmem [resolvable:$true] %s171_s0 }
  0x43   : > { %s159_s3 = scalar_lea.sflag [#allocation6], %s1044_s12  ;;  %s762_s25 = scalar_lea.hbm %s1100_s23, 2048 }
  0x44   : > { %p763_p10 = scmp.ne.s32.totalorder %s1100_s23, %s762_s25  ;;  %s767_s30 = scalar_lea.hbm %s1247_s1, 8192 }
  0x45   : > { %p768_p6 = scmp.lt.u32.totalorder %s1100_s23, %s1247_s1  ;;  %p769_p9 = scmp.lt.u32.totalorder %s767_s30, %s762_s25 }
  0x46   : > { %p765_p0 = pnand %p763_p10, %p734_p8  ;;  %p771_p11 = scmp.lt.u32.totalorder %s762_s25, %s1100_s23 }
  0x47   : > { %p770_p5 = por %p769_p9, %p768_p6 }
  0x48   : > { %p766_p1 = pneg %p765_p0 }
  0x49   : > { %p772_p13 = por %p771_p11, %p770_p5 }
  0x4b   : > { %p773_p4 = pnand %p772_p13, %p766_p1 }
  0x4d   : > { %776 = shalt.err (!%p773_p4)
}
  0x4e   : > { %s777_s29 = scalar_lea.vmem %s1108_s0, 2048  ;;  %s921_s22 = smov [#allocation5]  }
  0x4f   : > { %p778_p12 = scmp.ne.s32.totalorder %s1108_s0, %s777_s29  ;;  %s782_s4 = sshll.u32 %s921_s22, 4  ;;  %s783_s4 = int_to_ptr.vmem [resolvable:$false] %s782_s4 }
  0x50   : > { %s784_s26 = scalar_lea.vmem %s783_s4, 4096  ;;  %p785_p7 = scmp.lt.s32.totalorder %s1108_s0, %s783_s4 }
  0x51   : > { %p780_p10 = pnand %p778_p12, %p734_p8  ;;  %p786_p6 = scmp.lt.s32.totalorder %s784_s26, %s777_s29 }
  0x53   : > { %p781_p0 = pneg %p780_p10  ;;  %p787_p9 = por %p786_p6, %p785_p7 }
  0x55   : > { %p788_p5 = pnand %p787_p9, %p781_p0 }
  0x57   : > { %791 = shalt.err (!%p788_p5)
}
  0x58   : > { %s922_s25 = smov 64   ;;  %s923_s30 = smov 4  }
  0x59   : > { %616 = dma.hbm_to_vmem [thread:$0]  (!%p1059_p3), %s1100_s23, 2048, %s1108_s0, %s159_s3, %s922_s25, %s922_s25, %s923_s30  }
  0x5a   : > { %183 = sbr.rel (%p1104_p2) target bundleno = 374 (0x176), region = 28  ;;  %s185_s21 = sand.u32 (!%p1104_p2), 1, %s894_s13  }
  0x5b   : > { %s554_s27 = sshll.u32 (!%p1104_p2), %s185_s21, 3  ;;  %s186_s29 = scalar_lea.sflag (!%p1104_p2), [#allocation3], %s185_s21 }
  0x5c   : > { %s1139_s22 = scalar_lea.vmem (!%p1104_p2), [#allocation2], %s554_s27  ;;  %p1265_p7 = scmp.ne.s32.totalorder (!%p1104_p2), %s1257_s28, 0 }
  0x61   : > { %865 = dma.done.wait (%p1265_p7), %s186_s29, 128  }
  0x62   : > { %867 = vsyncadd (%p1265_p7), %s186_s29, 4294967168  ;;  %s555_s4 = sshll.u32 %s185_s21, 7  ;;  %s195_s5 = scalar_lea.sflag [#allocation6], %s185_s21 }
  0x63   : > { %s1145_s12 = scalar_lea.vmem [#allocation5], %s555_s4 }
  0x64   : > { %869 = dma.done.wait (%p1265_p7), %s195_s5, 2048  }
  0x65   : > { %871 = vsyncadd (%p1265_p7), %s195_s5, 4294965248  ;;  %s221_s0 = sand.u32 1, %s882_s10   ;;  %p557_p3 = scmp.ne.s32.totalorder %s902_s15, 0 }
  0x66   : > { %s556_s23 = sshll.u32 %s221_s0, 3  ;;  %v924_v0 = vmov (!%p557_p3), 0.0  }
  0x67   : > { %s1154_s24 = scalar_lea.vmem [#allocation7], %s556_s23  ;;  %234 = sbr.rel (%p557_p3) target bundleno = 110 (0x6e), region = 40 }
  0x68   : > { %235 = vst [vmem:[%s1154_s24] sm:$0xff] (!%p557_p3), %v924_v0 }
  0x6e PF: > { %v714_v1 = vld [vmem:[%s1145_s12 + $0x40] sm:$0xff]   ;;  %v716_v3 = vld [vmem:[%s1145_s12 + $0x48] sm:$0xff]   ;;  %v718_v5 = vld [vmem:[%s1145_s12 + $0x50] sm:$0xff]   ;;  %s577_s15 = sshll.u32 %s906_s16, 7  ;;  %s429_s28 = sshll.u32 %s1154_s24, 4  ;;  %s1183_s28 = int_to_ptr.vmem [resolvable:$true] %s429_s28 }
  0x6f   : > { %v715_v2 = vld [vmem:[%s1145_s12] sm:$0xff]   ;;  %582 = vmatprep.subr.bf16.mxu0 %v714_v1  ;;  %v717_v4 = vld [vmem:[%s1145_s12 + $0x8] sm:$0xff]   ;;  %v719_v6 = vld [vmem:[%s1145_s12 + $0x10] sm:$0xff]   ;;  %s1181_s25 = scalar_lea.hbm %s1248_s2, %s577_s15  ;;  %s416_s30 = scalar_lea.sflag [#allocation4], %s221_s0 }
  0x70   : > { %583 = vmatpush3.bf16.msra.mxu0 %v715_v2  ;;  %v720_v7 = vld [vmem:[%s1145_s12 + $0x58] sm:$0xff]   ;;  %v722_v9 = vld [vmem:[%s1145_s12 + $0x60] sm:$0xff]   ;;  %v724_v11 = vld [vmem:[%s1145_s12 + $0x68] sm:$0xff]   ;;  %s792_s21 = scalar_lea.vmem %s1183_s28, 128  ;;  %p1266_p2 = scmp.ne.s32.totalorder %s1258_s8, 0 }
  0x71   : > { %584 = vmatprep.subr.bf16.mxu0 %v716_v3  ;;  %v721_v8 = vld [vmem:[%s1145_s12 + $0x18] sm:$0xff]   ;;  %v723_v10 = vld [vmem:[%s1145_s12 + $0x20] sm:$0xff]   ;;  %v725_v14 = vld [vmem:[%s1145_s12 + $0x28] sm:$0xff]   ;;  %p793_p8 = scmp.ne.s32.totalorder %s1183_s28, %s792_s21  ;;  %s925_s16 = smov [#allocation7]  }
  0x72   : > { %v237_v12 = vld [vmem:[%s1139_s22] sm:$0xff]  ;;  %v236_v21 = vld [vmem:[%s1154_s24] sm:$0xff]  ;;  %s796_s27 = sshll.u32 %s925_s16, 4  ;;  %s797_s27 = int_to_ptr.vmem [resolvable:$false] %s796_s27 }
  0x73   : > { %v559_v13 = vcombine.high %v237_v12, %v237_v12  ;;  %v726_v15 = vld [vmem:[%s1145_s12 + $0x70] sm:$0xff]   ;;  %v728_v17 = vld [vmem:[%s1145_s12 + $0x78] sm:$0xff]   ;;  %v558_v19 = vcombine.low %v237_v12, %v237_v12  ;;  %p794_p1 = pnand %p793_p8, %p1266_p2  ;;  %s798_s29 = scalar_lea.vmem %s797_s27, 256 }
  0x74   : > { %585 = vmatpush3.bf16.msra.mxu0 %v717_v4  ;;  %v727_v16 = vld [vmem:[%s1145_s12 + $0x30] sm:$0xff]   ;;  %v729_v18 = vld [vmem:[%s1145_s12 + $0x38] sm:$0xff]   ;;  %p799_p13 = scmp.lt.s32.totalorder %s1183_s28, %s797_s27  ;;  %p800_p4 = scmp.lt.s32.totalorder %s798_s29, %s792_s21 }
  0x75   : > { %586 = vmatprep.subr.bf16.mxu0 %v718_v5  ;;  %405 = vmatprep.mubr.bf16.mxu0 %v559_v13  ;;  %p795_p11 = pneg %p794_p1 }
  0x76   : > { %p801_p12 = por %p800_p4, %p799_p13 }
  0x78   : > { %587 = vmatpush3.bf16.msra.mxu0 %v719_v6  ;;  %p802_p10 = pnand %p801_p12, %p795_p11 }
  0x79   : > { %588 = vmatprep.subr.bf16.mxu0 %v720_v7 }
  0x7c   : > { %589 = vmatpush3.bf16.msra.mxu0 %v721_v8 }
  0x7d   : > { %590 = vmatprep.subr.bf16.mxu0 %v722_v9 }
  0x80   : > { %591 = vmatpush3.bf16.msra.mxu0 %v723_v10 }
  0x81   : > { %592 = vmatprep.subr.bf16.mxu0 %v724_v11 }
  0x84   : > { %593 = vmatpush3.bf16.msra.mxu0 %v725_v14 }
  0x85   : > { %594 = vmatprep.subr.bf16.mxu0 %v726_v15 }
  0x88   : > { %595 = vmatpush3.bf16.msra.mxu0 %v727_v16 }
  0x89   : > { %596 = vmatprep.subr.bf16.mxu0 %v728_v17 }
  0x8c   : > { %597 = vmatpush3.bf16.msra.mxu0 %v729_v18 }
  0x8f   : > { %406 = vmatmul.mubr.bf16.vlgmr.msra.gmra.mrb[0].mxu0 %v558_v19 }
 0x162   : > { %v598_v20 = vpop.f32.mrb[0].mxu0 }
 0x163   : > { %v599_v22 = vpop.f32.mrb[1].mxu0 }
 0x164   : > { %v600_v23 = vadd.f32 %v599_v22, %v598_v20  ;;  %v601_v24 = vpop.f32.mrb[2].mxu0 }
 0x165   : > { %v602_v25 = vpop.f32.mrb[3].mxu0 }
 0x166   : > { %v413_v26 = vadd.f32 %v600_v23, %v236_v21 }
 0x168   : > { %414 = vst [vmem:[%s1154_s24] sm:$0xff] %v413_v26 }
 0x169   : > { %805 = shalt.err (!%p802_p10)
}
 0x16a   : > { %s806_s22 = scalar_lea.hbm %s1181_s25, 128  ;;  %s810_s12 = scalar_lea.hbm %s1248_s2, 256 }
 0x16b   : > { %p807_p0 = scmp.ne.s32.totalorder %s1181_s25, %s806_s22  ;;  %p811_p5 = scmp.lt.u32.totalorder %s1181_s25, %s1248_s2 }
 0x16c   : > { %p812_p7 = scmp.lt.u32.totalorder %s810_s12, %s806_s22  ;;  %p814_p8 = scmp.lt.u32.totalorder %s806_s22, %s1181_s25 }
 0x16d   : > { %p808_p6 = pnand %p807_p0, %p1266_p2 }
 0x16e   : > { %p813_p3 = por %p812_p7, %p811_p5 }
 0x16f   : > { %p809_p9 = pneg %p808_p6 }
 0x170   : > { %p815_p1 = por %p814_p8, %p813_p3 }
 0x172   : > { %p816_p11 = pnand %p815_p1, %p809_p9 }
 0x174   : > { %819 = shalt.err (!%p816_p11)
}
 0x175   : > { %608 = dma.vmem_to_hbm [thread:$0]  (%p1266_p2), %s1183_s28, 128, %s1181_s25, %s416_s30  }
 0x176 PF: > { %p622_p13 = scmp.ge.s32.totalorder %s918_s19, 2  ;;  %s441_s24 = sand.u32 1, %s878_s9  }
 0x177   : > { %p1267_p4 = scmp.ne.s32.totalorder %s1259_s20, 0  ;;  %s442_s15 = scalar_lea.sflag [#allocation4], %s441_s24 }
 0x179   : > { %p618_p12 = pnand %p622_p13, %p1267_p4 }
 0x17b   : > { %873 = dma.done.wait (!%p618_p12), %s442_s15, 128  }
 0x17c   : > { %875 = vsyncadd (!%p618_p12), %s442_s15, 4294967168  ;;  %s21_s19 = sadd.s32 1, %s918_s19   ;;  %s1268_s8 = sld [smem:[#allocation11_spill]] }
 0x17d   : > { %p18_p10 = scmp.ge.s32.totalorder %s21_s19, 6   ;;  %s1269_s28 = sld [smem:[#allocation12_spill]] }
 0x17e   : > { %s1270_s9 = smov %s882_s10  ;;  %s1271_s10 = smov %s886_s11 }
 0x17f   : > { %s1272_s11 = smov %s1029_s6  ;;  %s1273_s12 = smov %s894_s13 }
 0x180   : > { %s1274_s13 = smov %s898_s14  ;;  %s1275_s14 = smov %s1032_s7 }
 0x181   : > { %s1276_s15 = smov %s910_s17  ;;  %s1277_s16 = smov %s914_s18 }
 0x182   : > { %s1278_s17 = smov %s1268_s8  ;;  %20 = sbr.rel (!%p18_p10) target bundleno = 13 (0xd), region = 90 }
 0x183   : > { %s1279_s18 = smov %s1269_s28 }
 0x189   :  { %447 = vsyncpa [#allocation3], 1 }
 0x18a   :  { %449 = vsyncpa [#allocation3 + $0x1], 1 }
 0x18b   :  { %450 = vsyncpa [#allocation6], 1 }
 0x18c   :  { %452 = vsyncpa [#allocation6 + $0x1], 1 }
 0x18d   :  { %453 = vsyncpa [#allocation4], 1 }
 0x18e   :  { %455 = vsyncpa [#allocation4 + $0x1], 1 }

</bundles_post_ra>
